<compile_context>
chip_gen: v7x
topology: tpu7x:2x2x1
jax: 0.10.0
libtpu: 0.0.40
codegen_flags: <defaults>
</compile_context>

<pallas_src>
import functools

import jax
import jax.numpy as jnp
from jax.experimental import pallas as pl
from jax.experimental.pallas import tpu as pltpu


def _round_up(x, m):
    return ((x + m - 1) // m) * m


def _ce_kernel(pred_ref, label_ref, nll_ref, *, c_total, bc):
    # pred_ref : (bn, bc) native-dtype tile of probabilities (edge blocks carry
    #            unspecified garbage in OOB rows/columns -- never selected).
    # label_ref: (bn, 1)  int32 target class ids for this row block.
    # nll_ref  : (bn, 1)  f32 output block, resident across the class axis;
    #            doubles as the accumulator (gathered prob, then -log at end).
    j = pl.program_id(1)

    @pl.when(j == 0)
    def _init():
        nll_ref[...] = jnp.zeros_like(nll_ref)

    pred = pred_ref[...]                              # (bn, bc), native dtype
    bn, bc_ = pred.shape

    # Per-row local label for this class tile; clamp labels that would point at
    # the (unspecified) OOB columns of a partial last tile to -1 (never matches
    # a lane index). O(bn) work instead of an O(bn*bc) `col < C` mask; labels in
    # other tiles end up negative or >= bc and never match either.
    labels_local = label_ref[...] - j * bc            # (bn, 1) int32
    c_rem = c_total - j * bc                          # valid lanes in this tile
    labels_local = jnp.where(labels_local < c_rem, labels_local, -1)

    # Loop-invariant lane iota: one cmp + one select per element (VPU only).
    col = jax.lax.broadcasted_iota(jnp.int32, (bn, bc_), 1)
    hit = col == labels_local
    picked = jnp.where(hit, pred, jnp.zeros_like(pred))
    # Exactly one nonzero per row across all class tiles -> lane-sum is exact
    # even in bf16; only the (bn, 1) gathered values are promoted to f32.
    nll_ref[...] += jnp.sum(picked, axis=-1, keepdims=True).astype(jnp.float32)

    @pl.when(j == pl.num_programs(1) - 1)
    def _finalize():
        # log only bn values (EUP), once per row block.
        nll_ref[...] = -jnp.log(nll_ref[...])


@functools.partial(jax.jit, static_argnames=("block_n", "block_c"))
def cross_entropy_loss(pred, label, *, block_n=512, block_c=2048):
    """pred: (N, C) probabilities (any float dtype); label: (N,) ints -> scalar."""
    n, c = pred.shape
    itemsize = jnp.dtype(pred.dtype).itemsize

    # Tile sizes: fall back to the full array dims for small N/C (always legal
    # via the full-dim exemption), otherwise large (8,128)-aligned blocks so
    # each grid step streams a multi-MiB pred slab.
    bn = min(block_n, n)
    bc = min(block_c, c)

    grid = (pl.cdiv(n, bn), pl.cdiv(c, bc))
    n_pad = grid[0] * bn

    # Tiny label pad only (pred itself is streamed unpadded); padded rows pick
    # garbage and are sliced away before the mean.
    label2d = jnp.pad(label.astype(jnp.int32), (0, n_pad - n)).reshape(n_pad, 1)

    # Explicit scoped-VMEM budget: 2x double-buffered pred tile + headroom,
    # floored at 32 MiB (v5e's default scoped limit is only 16 MiB).
    tile_bytes = _round_up(bn, 8) * _round_up(bc, 128) * itemsize
    vmem_limit = int(max(32 << 20, 4 * tile_bytes + (2 << 20)))

    kernel = functools.partial(_ce_kernel, c_total=c, bc=bc)

    nll = pl.pallas_call(
        kernel,
        out_shape=jax.ShapeDtypeStruct((n_pad, 1), jnp.float32),
        grid_spec=pltpu.PrefetchScalarGridSpec(
            num_scalar_prefetch=0,
            grid=grid,
            in_specs=[
                pl.BlockSpec((bn, bc), lambda i, j: (i, j)),   # pred tile
                pl.BlockSpec((bn, 1), lambda i, j: (i, 0)),    # labels per row block
            ],
            out_specs=pl.BlockSpec((bn, 1), lambda i, j: (i, 0)),
        ),
        compiler_params=pltpu.CompilerParams(
            dimension_semantics=("parallel", "arbitrary"),
            vmem_limit_bytes=vmem_limit,
        ),
        cost_estimate=pl.CostEstimate(
            flops=3 * n * c,
            transcendentals=n,
            bytes_accessed=n * c * itemsize + n * 4 + n_pad * 4,
        ),
    )(pred, label2d)

    # Tiny finalization outside the kernel: mean over the real rows.
    return jnp.sum(nll[:n, 0]) / n


def _reference(pred, label):
    n = pred.shape[0]
    return -jnp.mean(jnp.log(pred.astype(jnp.float32))[jnp.arange(n), label])


if __name__ == "__main__":
    key = jax.random.PRNGKey(0)

    # Small shape consistent with the module: batch=8, classes=32, f32 probs.
    k1, k2 = jax.random.split(key)
    N, C = 8, 32
    logits = jax.random.normal(k1, (N, C), dtype=jnp.float32)
    pred = jax.nn.softmax(logits, axis=-1)
    label = jax.random.randint(k2, (N,), 0, C, dtype=jnp.int32)

    loss = cross_entropy_loss(pred, label)
    jax.block_until_ready(loss)
    ref = _reference(pred, label)
    assert jnp.allclose(loss, ref, rtol=1e-5, atol=1e-6), (loss, ref)

    # Exercise the non-aligned (edge-block) path: no pred padding, label clamp.
    k3, k4 = jax.random.split(k2)
    N2, C2 = 200, 700
    logits2 = jax.random.normal(k3, (N2, C2), dtype=jnp.float32)
    pred2 = jax.nn.softmax(logits2, axis=-1)
    label2 = jax.random.randint(k4, (N2,), 0, C2, dtype=jnp.int32)
    loss2 = cross_entropy_loss(pred2, label2)
    jax.block_until_ready(loss2)
    ref2 = _reference(pred2, label2)
    assert jnp.allclose(loss2, ref2, rtol=1e-5, atol=1e-6), (loss2, ref2)

    # Exercise multi-block tiling with small explicit block sizes (row blocks
    # partial on the edge, multiple class tiles).
    loss2b = cross_entropy_loss(pred2, label2, block_n=64, block_c=256)
    jax.block_until_ready(loss2b)
    assert jnp.allclose(loss2b, ref2, rtol=1e-5, atol=1e-6), (loss2b, ref2)

    # Native-bf16 streaming path (halved HBM bytes; only gathered values promoted).
    pred3 = pred2.astype(jnp.bfloat16)
    loss3 = cross_entropy_loss(pred3, label2)
    jax.block_until_ready(loss3)
    ref3 = _reference(pred3, label2)
    assert jnp.allclose(loss3, ref3, rtol=1e-5, atol=1e-6), (loss3, ref3)

    print("KERNEL_OK")
</pallas_src>

<mosaic_0001>
module attributes {stable_mosaic.version = 11 : i64} {
  func.func @_ce_kernel(%arg0: i32, %arg1: i32, %arg2: memref<8x32xf32, #tpu.memory_space<vmem>>, %arg3: memref<8x1xi32, #tpu.memory_space<vmem>>, %arg4: memref<8x1xf32, #tpu.memory_space<vmem>>) attributes {dimension_semantics = [#tpu.dimension_semantics<parallel>, #tpu.dimension_semantics<arbitrary>], iteration_bounds = array<i64: 1, 1>, scalar_prefetch = 0 : i64, scratch_operands = 0 : i64, tpu.core_type = #tpu.core_type<tc>, window_params = [{transform_indices = @transform_0, window_bounds = array<i64: 8, 32>}, {transform_indices = @transform_1, window_bounds = array<i64: 8, 1>}, {transform_indices = @transform_2, window_bounds = array<i64: 8, 1>}]} {
    %c0_i32 = arith.constant 0 : i32
    %0 = arith.cmpi eq, %arg1, %c0_i32 : i32
    %1 = arith.extui %0 : i1 to i32
    %c0_i32_0 = arith.constant 0 : i32
    %2 = arith.cmpi ne, %1, %c0_i32_0 : i32
    scf.if %2 {
      %cst_13 = arith.constant 0.000000e+00 : f32
      %27 = vector.broadcast %cst_13 : f32 to vector<8x1xf32>
      %c0_14 = arith.constant 0 : index
      %c0_15 = arith.constant 0 : index
      %28 = vector.load %arg4[%c0_14, %c0_15] : memref<8x1xf32, #tpu.memory_space<vmem>>, vector<8x1xf32>
      tpu.vector_store %arg4[%c0_14, %c0_15], %27 {strides = array<i32>} : memref<8x1xf32, #tpu.memory_space<vmem>>, vector<8x1xf32>,
    } else {
    }
    %c0 = arith.constant 0 : index
    %c0_1 = arith.constant 0 : index
    %3 = vector.load %arg2[%c0, %c0_1] : memref<8x32xf32, #tpu.memory_space<vmem>>, vector<8x32xf32>
    %c0_2 = arith.constant 0 : index
    %c0_3 = arith.constant 0 : index
    %4 = vector.load %arg3[%c0_2, %c0_3] : memref<8x1xi32, #tpu.memory_space<vmem>>, vector<8x1xi32>
    %c32_i32 = arith.constant 32 : i32
    %5 = arith.muli %arg1, %c32_i32 : i32
    %6 = vector.broadcast %5 : i32 to vector<8x1xi32>
    %7 = arith.subi %4, %6 : vector<8x1xi32>
    %c32_i32_4 = arith.constant 32 : i32
    %8 = arith.muli %arg1, %c32_i32_4 : i32
    %c32_i32_5 = arith.constant 32 : i32
    %9 = arith.subi %c32_i32_5, %8 : i32
    %10 = vector.broadcast %9 : i32 to vector<8x1xi32>
    %11 = arith.cmpi slt, %7, %10 : vector<8x1xi32>
    %c-1_i32 = arith.constant -1 : i32
    %12 = vector.broadcast %c-1_i32 : i32 to vector<8x1xi32>
    %13 = arith.select %11, %7, %12 : vector<8x1xi1>, vector<8x1xi32>
    %14 = tpu.iota {dimensions = array<i32: 1>} : vector<8x32xi32>
    %15 = vector.broadcast %13 : vector<8x1xi32> to vector<8x32xi32>
    %16 = arith.cmpi eq, %14, %15 : vector<8x32xi32>
    %cst = arith.constant 0.000000e+00 : f32
    %17 = vector.broadcast %cst : f32 to vector<8x32xf32>
    %18 = arith.select %16, %3, %17 : vector<8x32xi1>, vector<8x32xf32>
    %c0_6 = arith.constant 0 : index
    %c0_7 = arith.constant 0 : index
    %19 = vector.load %arg4[%c0_6, %c0_7] : memref<8x1xf32, #tpu.memory_space<vmem>>, vector<8x1xf32>
    %cst_8 = arith.constant dense<0.000000e+00> : vector<8xf32>
    %20 = vector.multi_reduction <add>, %18, %cst_8 [1] : vector<8x32xf32> to vector<8xf32>
    %21 = vector.shape_cast %20 : vector<8xf32> to vector<8x1xf32>
    %22 = arith.addf %19, %21 : vector<8x1xf32>
    %c0_9 = arith.constant 0 : index
    %c0_10 = arith.constant 0 : index
    %23 = vector.load %arg4[%c0_9, %c0_10] : memref<8x1xf32, #tpu.memory_space<vmem>>, vector<8x1xf32>
    tpu.vector_store %arg4[%c0_9, %c0_10], %22 {strides = array<i32>} : memref<8x1xf32, #tpu.memory_space<vmem>>, vector<8x1xf32>,
    %c0_i32_11 = arith.constant 0 : i32
    %24 = arith.cmpi eq, %arg1, %c0_i32_11 : i32
    %25 = arith.extui %24 : i1 to i32
    %c0_i32_12 = arith.constant 0 : i32
    %26 = arith.cmpi ne, %25, %c0_i32_12 : i32
    scf.if %26 {
      %c0_13 = arith.constant 0 : index
      %c0_14 = arith.constant 0 : index
      %27 = vector.load %arg4[%c0_13, %c0_14] : memref<8x1xf32, #tpu.memory_space<vmem>>, vector<8x1xf32>
      %28 = math.log %27 : vector<8x1xf32>
      %cst_15 = arith.constant 0.000000e+00 : f32
      %29 = vector.broadcast %cst_15 : f32 to vector<8x1xf32>
      %30 = arith.subf %29, %28 : vector<8x1xf32>
      %c0_16 = arith.constant 0 : index
      %c0_17 = arith.constant 0 : index
      %31 = vector.load %arg4[%c0_16, %c0_17] : memref<8x1xf32, #tpu.memory_space<vmem>>, vector<8x1xf32>
      tpu.vector_store %arg4[%c0_16, %c0_17], %30 {strides = array<i32>} : memref<8x1xf32, #tpu.memory_space<vmem>>, vector<8x1xf32>,
    } else {
    }
    return
  }
  func.func @transform_0(%arg0: i32, %arg1: i32) -> (i32, i32) {
    %c0_i32 = arith.constant 0 : i32
    return %arg0, %arg1 : i32, i32
  }
  func.func @transform_1(%arg0: i32, %arg1: i32) -> (i32, i32) {
    %c0_i32 = arith.constant 0 : i32
    %c0_i32_0 = arith.constant 0 : i32
    return %arg0, %c0_i32 : i32, i32
  }
  func.func @transform_2(%arg0: i32, %arg1: i32) -> (i32, i32) {
    %c0_i32 = arith.constant 0 : i32
    %c0_i32_0 = arith.constant 0 : i32
    return %arg0, %c0_i32 : i32, i32
  }
}

</mosaic_0001>

<bundles_post_ra>
// kernel: cross_entropy_loss.1
= control target key start
LH: loop header
LB: loop body
LE: loop exit
PB: predicated region body
PF: predicated region fallthrough
CT: control target
= control target key end

     0   :  { %v58_v0 = vmov 0   ;;  %vm15_vm1 = vcmask 7168   ;;  %v59_v3 = vmov 0.0   ;;  %v26_v4 = vlaneseq  ;;  %s99_s1 = inlined_call_operand.vmem [shape: s32[8,1], index: 1, kind: input, shape index: {}]   ;;  %s100_s2 = inlined_call_operand.vmem [shape: f32[8,1], index: 2, kind: output, shape index: {}]   ;;  %s101_s0 = inlined_call_operand.vmem [shape: f32[8,32], index: 0, kind: input, shape index: {}]  }
   0x1   :  { %55 = vset.pattern.permute.xlu0 %v58_v0  ;;  %v18_v1 = vld [vmem:[%s99_s1] sm:$0xff]  ;;  %16 = vst.msk [vmem:[%s100_s2] sm:$0xff] %vm15_vm1, %v59_v3  ;;  %vm34_vm2 = vcmask 261120  }
   0x2   :  { %vm24_vm0 = vcmp.lt.s32.totalorder %v18_v1, 32  ;;  %v27_v5 = vand.u32 127, %v26_v4  ;;  %v17_v6 = vld [vmem:[%s101_s0] sm:$0xff] }
   0x3   :  { %v25_v2 = vsel %vm24_vm0, %v18_v1, 4294967295 }
   0x4   :  { %29 = vperm.xlu0 %55, %v25_v2  }
   0x8   :  { %v33_v10 = vld [vmem:[%s100_s2] sm:$0xff] }
  0x83   :  { %v30_v7 = vpop.permute.xlu0 %29 }
  0x84   :  { %vm31_vm3 = vcmp.eq.s32.totalorder %v27_v5, %v30_v7 }
  0x85   :  { %v32_v8 = vsel %vm31_vm3, %v17_v6, 0.0 }
  0x86   :  { %v35_v9 = vsel %vm34_vm2, %v32_v8, 0.0 }
  0x87   :  { %36 = vadd.xlane.f32.xlu0 %v35_v9 }
 0x114   :  { %v37_v11 = vpop.xlane.xlu0 %36 }
 0x115   :  { %v38_v12 = vadd.f32 %v37_v11, %v33_v10 }
 0x117   :  { %40 = vst.msk [vmem:[%s100_s2] sm:$0xff] %vm15_vm1, %v38_v12 }
 0x11e   :  { %v44_v13 = vld [vmem:[%s100_s2] sm:$0xff] }
 0x11f   :  { %56 = vlog2.f32 %v44_v13 }
 0x129   :  { %v57_v14 = vpop.eup %56 }
 0x12a   :  { %v46_v15 = vmul.f32 0.6931472, %v57_v14 }
 0x12c   :  { %v47_v16 = vsub.f32 0.0, %v46_v15 }
 0x12e   :  { %48 = vst.msk [vmem:[%s100_s2] sm:$0xff] %vm15_vm1, %v47_v16 }

</bundles_post_ra>
